<compile_context>
chip_gen: v7x
topology: tpu7x:2x2x1
jax: 0.10.0
libtpu: 0.0.40
codegen_flags: <defaults>
</compile_context>

<pallas_src>
import functools

import jax
import jax.numpy as jnp
from jax.experimental import pallas as pl
from jax.experimental.pallas import tpu as pltpu


def _gat_kernel(wh1_ref, wh2_ref, adj_ref, wh_ref, out_ref, *, alpha, concat):
    f32 = jnp.float32

    wh1 = wh1_ref[...]                 # (TILE_Q, 1)  f32, per-tile query projection
    wh2 = wh2_ref[...]                 # (1, N)       f32, key projection (resident)
    adj = adj_ref[...]                 # (TILE_Q, N)  streamed adjacency tile
    wh = wh_ref[...]                   # (N, F_pad)   bf16 values (resident)

    # Attention logits + LeakyReLU (alpha in (0,1) -> single maximum on the VPU).
    e = wh1 + wh2                                              # (TILE_Q, N)
    if 0.0 <= alpha <= 1.0:
        e = jnp.maximum(e, alpha * e)
    else:
        e = jnp.where(e > 0, e, alpha * e)

    # Adjacency mask (torch uses -9e15 for non-edges).
    att = jnp.where(adj > 0, e, jnp.float32(-9e15))            # (TILE_Q, N) f32

    # Numerically-stable softmax along dim=1.
    # Exponent in bf16 (fast EUP on v6e/v7x); denominator accumulated in f32.
    att_max = jnp.max(att, axis=1, keepdims=True)              # (TILE_Q, 1)
    p = jnp.exp((att - att_max).astype(jnp.bfloat16))          # (TILE_Q, N) bf16
    denom = jnp.sum(p, axis=1, keepdims=True, dtype=f32)       # (TILE_Q, 1) f32
    inv = pl.reciprocal(denom, approx=True)                    # EUP slot

    # TODO(synk): F.dropout on the attention matrix is skipped (eval mode).

    # Un-normalized value matmul on the MXU (bf16 x bf16 -> f32 acc), then the
    # per-row softmax normalization applied to the (TILE_Q, F_pad) result.
    acc = jnp.dot(p, wh, preferred_element_type=f32)           # (TILE_Q, F_pad)
    h_prime = acc * inv

    if concat:
        # ELU (alpha=1.0, PyTorch default). min() keeps the unselected branch finite.
        h_prime = jnp.where(h_prime > 0, h_prime,
                            jnp.exp(jnp.minimum(h_prime, 0.0)) - 1.0)

    out_ref[...] = h_prime.astype(out_ref.dtype)


def gat_forward(h, adj, W, a, *, alpha=0.2, concat=True, tile_q=128):
    """Pallas implementation of GraphAttentionLayer.forward (eval mode)."""
    N, f_in = h.shape
    f_out = W.shape[1]
    assert adj.shape == (N, N)
    assert a.shape == (2 * f_out, 1)

    # On v5e (128 MiB VMEM, 128-wide MXU) tile_q=256 is a good choice when N
    # allows; 128 is the portable default (also fits v7x's 64 MiB / TC).
    tile_q = min(tile_q, N)
    assert N % tile_q == 0, "N must be divisible by tile_q"
    num_tiles = N // tile_q

    f32 = jnp.float32
    # Output-feature axis padded to a multiple of 128 lanes (lane-dense stores,
    # MXU-friendly tiles); padded columns of Wh are zero, sliced off at the end.
    f_pad = max(128, ((f_out + 127) // 128) * 128)

    # ---- Grid-invariant projections: plain XLA dots in the wrapper ----------
    h32 = h.astype(f32)
    W32 = W.astype(f32)
    a32 = a.astype(f32)
    Wh = h32 @ W32                                   # (N, f_out)  f32 (logit path)
    wh1 = Wh @ a32[:f_out, :]                        # (N, 1)      query-side
    wh2 = (Wh @ a32[f_out:, :]).T                    # (1, N)      key-side
    # Value-side Wh pre-cast to bf16 + zero-padded to f_pad lanes.
    Wh_bf16 = jnp.pad(Wh.astype(jnp.bfloat16), ((0, 0), (0, f_pad - f_out)))

    # ---- Advisory cost estimate ---------------------------------------------
    flops = 2 * N * N * f_pad + 8 * N * N            # att@Wh + N^2 elementwise chain
    transcendentals = N * N + N * f_pad + N          # exp (softmax), exp (elu), recip
    bytes_accessed = (N * N * adj.dtype.itemsize     # adjacency (only O(N^2) stream)
                      + N * f_pad * 2                # Wh bf16
                      + N * f_pad * 4                # output
                      + 2 * N * 4)                   # wh1, wh2

    # ---- VMEM budget ----------------------------------------------------------
    # Pallas double-buffers every input/output block (including constant-index
    # "resident" ones), so count x2 for each; add elementwise temporaries.
    adj_bytes = adj.dtype.itemsize
    blocks = (2 * tile_q * 128 * 4        # wh1 tile (lane-padded)
              + 2 * 8 * N * 4             # wh2 (sublane-padded)
              + 2 * tile_q * N * adj_bytes
              + 2 * N * f_pad * 2         # Wh bf16 (constant block)
              + 2 * tile_q * f_pad * 4)   # output tile
    temps = (3 * tile_q * N * 4           # e / att / masked f32 temporaries
             + tile_q * N * 2             # p (bf16)
             + 2 * tile_q * f_pad * 4)    # acc / elu temporaries
    needed = blocks + temps
    try:
        vmem_cap = int(pltpu.get_tpu_info().vmem_capacity_bytes)
    except Exception:
        vmem_cap = 64 << 20               # conservative: v7x per-TensorCore VMEM
    vmem_limit = int(min(max(needed * 5 // 4, 32 << 20), vmem_cap))

    # TODO(synk): for very large graphs (N beyond ~16-32k on v7x) add a second
    # grid axis over key tiles with an online-softmax running max/sum so the
    # resident (N, F_pad) Wh and the (tile_q, N) logits fit 64 MiB VMEM.
    # TODO(synk): if the surrounding model uses multiple attention heads, fuse
    # all heads into one pallas_call so the O(N^2) adjacency is read only once.

    kernel = functools.partial(_gat_kernel, alpha=float(alpha), concat=bool(concat))

    out_padded = pl.pallas_call(
        kernel,
        out_shape=jax.ShapeDtypeStruct((N, f_pad), jnp.float32),
        grid=(num_tiles,),
        in_specs=[
            pl.BlockSpec((tile_q, 1), lambda i: (i, 0)),      # wh1 rows of this tile
            pl.BlockSpec((1, N), lambda i: (0, 0)),           # wh2 row, resident
            pl.BlockSpec((tile_q, N), lambda i: (i, 0)),      # adj tile, streamed
            pl.BlockSpec((N, f_pad), lambda i: (0, 0)),       # Wh (bf16), resident
        ],
        out_specs=pl.BlockSpec((tile_q, f_pad), lambda i: (i, 0)),
        compiler_params=pltpu.CompilerParams(
            dimension_semantics=("parallel",),
            vmem_limit_bytes=vmem_limit,
        ),
        cost_estimate=pl.CostEstimate(
            flops=int(flops),
            transcendentals=int(transcendentals),
            bytes_accessed=int(bytes_accessed),
        ),
    )(wh1, wh2, adj, Wh_bf16)

    return out_padded[:, :f_out]


def _xavier_uniform(key, shape, gain):
    fan_in, fan_out = shape[0], shape[1]
    bound = gain * jnp.sqrt(6.0 / (fan_in + fan_out))
    return jax.random.uniform(key, shape, jnp.float32, -bound, bound)


def _reference(h, adj, W, a, alpha=0.2, concat=True):
    """Pure-JAX f32 reference matching the PyTorch forward (eval mode)."""
    f_out = W.shape[1]
    Wh = h @ W
    Wh1 = Wh @ a[:f_out, :]
    Wh2 = Wh @ a[f_out:, :]
    e = Wh1 + Wh2.T
    e = jnp.where(e > 0, e, alpha * e)
    att = jnp.where(adj > 0, e, -9e15)
    att = jax.nn.softmax(att, axis=1)
    h_prime = att @ Wh
    if concat:
        h_prime = jnp.where(h_prime > 0, h_prime, jnp.exp(h_prime) - 1.0)
    return h_prime


if __name__ == "__main__":
    # Small deterministic problem: N=256 nodes, in_features=64, out_features=32.
    N, F_IN, F_OUT = 256, 64, 32
    ALPHA = 0.2
    GAIN = 1.414

    key = jax.random.PRNGKey(0)
    k_h, k_adj, k_w, k_a = jax.random.split(key, 4)

    h = jax.random.normal(k_h, (N, F_IN), jnp.float32)
    # Random adjacency with self-loops (>0 entries define edges).
    adj = (jax.random.uniform(k_adj, (N, N)) > 0.5).astype(jnp.float32)
    adj = jnp.maximum(adj, jnp.eye(N, dtype=jnp.float32))

    # Deterministic xavier_uniform_ init (gain=1.414) as in the module __init__.
    W = _xavier_uniform(k_w, (F_IN, F_OUT), GAIN)
    a = _xavier_uniform(k_a, (2 * F_OUT, 1), GAIN)

    out = gat_forward(h, adj, W, a, alpha=ALPHA, concat=True, tile_q=128)
    out = jax.block_until_ready(out)

    ref = _reference(h, adj, W, a, alpha=ALPHA, concat=True)
    assert out.shape == (N, F_OUT)
    max_err = float(jnp.max(jnp.abs(out - ref)))
    # bf16 exp + bf16 operands in att@Wh + approx reciprocal -> loose tolerance.
    assert jnp.allclose(out, ref, atol=3e-2, rtol=3e-2), (
        f"mismatch vs reference (max abs err {max_err})")

    print("KERNEL_OK")
</pallas_src>

<mosaic_0001>
module attributes {stable_mosaic.version = 11 : i64} {
  func.func @_gat_kernel(%arg0: i32, %arg1: memref<128x1xf32, #tpu.memory_space<vmem>>, %arg2: memref<1x256xf32, #tpu.memory_space<vmem>>, %arg3: memref<128x256xf32, #tpu.memory_space<vmem>>, %arg4: memref<256x128xbf16, #tpu.memory_space<vmem>>, %arg5: memref<128x128xf32, #tpu.memory_space<vmem>>) attributes {dimension_semantics = [#tpu.dimension_semantics<parallel>], iteration_bounds = array<i64: 2>, scalar_prefetch = 0 : i64, scratch_operands = 0 : i64, tpu.core_type = #tpu.core_type<tc>, window_params = [{transform_indices = @transform_0, window_bounds = array<i64: 128, 1>}, {pipeline_mode = #tpu.pipeline_mode<synchronous>, transform_indices = @transform_1, window_bounds = array<i64: 1, 256>}, {transform_indices = @transform_2, window_bounds = array<i64: 128, 256>}, {pipeline_mode = #tpu.pipeline_mode<synchronous>, transform_indices = @transform_3, window_bounds = array<i64: 256, 128>}, {transform_indices = @transform_4, window_bounds = array<i64: 128, 128>}]} {
    %c0 = arith.constant 0 : index
    %c0_0 = arith.constant 0 : index
    %0 = vector.load %arg1[%c0, %c0_0] : memref<128x1xf32, #tpu.memory_space<vmem>>, vector<128x1xf32>
    %c0_1 = arith.constant 0 : index
    %c0_2 = arith.constant 0 : index
    %1 = vector.load %arg2[%c0_1, %c0_2] : memref<1x256xf32, #tpu.memory_space<vmem>>, vector<1x256xf32>
    %c0_3 = arith.constant 0 : index
    %c0_4 = arith.constant 0 : index
    %2 = vector.load %arg3[%c0_3, %c0_4] : memref<128x256xf32, #tpu.memory_space<vmem>>, vector<128x256xf32>
    %c0_5 = arith.constant 0 : index
    %c0_6 = arith.constant 0 : index
    %3 = vector.load %arg4[%c0_5, %c0_6] : memref<256x128xbf16, #tpu.memory_space<vmem>>, vector<256x128xbf16>
    %4 = vector.broadcast %0 : vector<128x1xf32> to vector<128x256xf32>
    %5 = vector.broadcast %1 : vector<1x256xf32> to vector<128x256xf32>
    %6 = arith.addf %4, %5 : vector<128x256xf32>
    %cst = arith.constant 2.000000e-01 : f32
    %7 = vector.broadcast %cst : f32 to vector<128x256xf32>
    %8 = arith.mulf %7, %6 : vector<128x256xf32>
    %9 = arith.maximumf %6, %8 : vector<128x256xf32>
    %cst_7 = arith.constant 0.000000e+00 : f32
    %10 = vector.broadcast %cst_7 : f32 to vector<128x256xf32>
    %11 = arith.cmpf ogt, %2, %10 : vector<128x256xf32>
    %cst_8 = arith.constant -9.000000e+15 : f32
    %12 = vector.broadcast %cst_8 : f32 to vector<128x256xf32>
    %13 = arith.select %11, %9, %12 : vector<128x256xi1>, vector<128x256xf32>
    %cst_9 = arith.constant dense<0xFF800000> : vector<128xf32>
    %14 = vector.multi_reduction <maximumf>, %13, %cst_9 [1] : vector<128x256xf32> to vector<128xf32>
    %15 = vector.shape_cast %14 : vector<128xf32> to vector<128x1xf32>
    %16 = vector.broadcast %15 : vector<128x1xf32> to vector<128x256xf32>
    %17 = arith.subf %13, %16 : vector<128x256xf32>
    %18 = arith.truncf %17 : vector<128x256xf32> to vector<128x256xbf16>
    %19 = math.exp %18 : vector<128x256xbf16>
    %20 = arith.extf %19 : vector<128x256xbf16> to vector<128x256xf32>
    %cst_10 = arith.constant dense<0.000000e+00> : vector<128xf32>
    %21 = vector.multi_reduction <add>, %20, %cst_10 [1] : vector<128x256xf32> to vector<128xf32>
    %22 = vector.shape_cast %21 : vector<128xf32> to vector<128x1xf32>
    %23 = tpu.reciprocal %22 {approx = true} : vector<128x1xf32> -> vector<128x1xf32>
    %cst_11 = arith.constant dense<0.000000e+00> : vector<128x128xf32>
    %24 = tpu.matmul %19, %3, %cst_11 {dimension_numbers = #tpu.dot_dimension_numbers<[1], [0], [0], [1], [0, 0, 1, 1], [], []>} : vector<128x256xbf16>, vector<256x128xbf16>, vector<128x128xf32> -> vector<128x128xf32>
    %25 = vector.broadcast %23 : vector<128x1xf32> to vector<128x128xf32>
    %26 = arith.mulf %24, %25 : vector<128x128xf32>
    %cst_12 = arith.constant 0.000000e+00 : f32
    %27 = vector.broadcast %cst_12 : f32 to vector<128x128xf32>
    %28 = arith.cmpf ogt, %26, %27 : vector<128x128xf32>
    %cst_13 = arith.constant 0.000000e+00 : f32
    %29 = vector.broadcast %cst_13 : f32 to vector<128x128xf32>
    %30 = arith.minimumf %26, %29 : vector<128x128xf32>
    %31 = math.exp %30 : vector<128x128xf32>
    %cst_14 = arith.constant 1.000000e+00 : f32
    %32 = vector.broadcast %cst_14 : f32 to vector<128x128xf32>
    %33 = arith.subf %31, %32 : vector<128x128xf32>
    %34 = arith.select %28, %26, %33 : vector<128x128xi1>, vector<128x128xf32>
    %c0_15 = arith.constant 0 : index
    %c0_16 = arith.constant 0 : index
    %35 = vector.load %arg5[%c0_15, %c0_16] : memref<128x128xf32, #tpu.memory_space<vmem>>, vector<128x128xf32>
    tpu.vector_store %arg5[%c0_15, %c0_16], %34 {strides = array<i32>} : memref<128x128xf32, #tpu.memory_space<vmem>>, vector<128x128xf32>,
    return
  }
  func.func @transform_0(%arg0: i32) -> (i32, i32) {
    %c0_i32 = arith.constant 0 : i32
    %c0_i32_0 = arith.constant 0 : i32
    return %arg0, %c0_i32 : i32, i32
  }
  func.func @transform_1(%arg0: i32) -> (i32, i32) {
    %c0_i32 = arith.constant 0 : i32
    %c0_i32_0 = arith.constant 0 : i32
    %c0_i32_1 = arith.constant 0 : i32
    return %c0_i32, %c0_i32_0 : i32, i32
  }
  func.func @transform_2(%arg0: i32) -> (i32, i32) {
    %c0_i32 = arith.constant 0 : i32
    %c0_i32_0 = arith.constant 0 : i32
    return %arg0, %c0_i32 : i32, i32
  }
  func.func @transform_3(%arg0: i32) -> (i32, i32) {
    %c0_i32 = arith.constant 0 : i32
    %c0_i32_0 = arith.constant 0 : i32
    %c0_i32_1 = arith.constant 0 : i32
    return %c0_i32, %c0_i32_0 : i32, i32
  }
  func.func @transform_4(%arg0: i32) -> (i32, i32) {
    %c0_i32 = arith.constant 0 : i32
    %c0_i32_0 = arith.constant 0 : i32
    return %arg0, %c0_i32 : i32, i32
  }
}

</mosaic_0001>

<bundles_post_ra>
// kernel: tpu_custom_call.1
= control target key start
LH: loop header
LB: loop body
LE: loop exit
PB: predicated region body
PF: predicated region fallthrough
CT: control target
= control target key end

     0   :  { %9 = vsyncpa [#allocation3], 0  ;;  %s2449_s0 = inlined_call_operand.vmem [shape: f32[256,1], index: 0, kind: input, shape index: {}]   ;;  %s2450_s1 = inlined_call_operand.vmem [shape: f32[1,256], index: 1, kind: input, shape index: {}]   ;;  %s2451_s2 = inlined_call_operand.hbm [shape: f32[256,256], index: 2, kind: input, shape index: {}]   ;;  %s2452_s3 = inlined_call_operand.vmem [shape: bf16[256,128], index: 3, kind: input, shape index: {}]   ;;  %s2453_s4 = inlined_call_operand.hbm [shape: f32[256,128], index: 4, kind: output, shape index: {}]  }
   0x1   :  { %11 = vsyncpa [#allocation3 + $0x1], 0 }
   0x2   :  { %12 = vsyncpa [#allocation4], 0 }
   0x3   :  { %14 = vsyncpa [#allocation4 + $0x1], 0  ;;  %s1661_s15 = smov 0   ;;  %s1663_s16 = smov 0  }
   0x4   :  { %s1665_s17 = smov 0   ;;  %s1667_s18 = smov 0  }
   0x5 LB: > { %s1682_s19 = sadd.s32 4294967295, %s1627_s18   ;;  %s1234_s20 = sadd.s32 4294967294, %s1627_s18   ;;  %s1627_s18 = sphi %s1667_s18, %s2466_s18   ;;  %s1623_s17 = sphi %s1665_s17, %s2465_s17   ;;  %s1619_s16 = sphi %s1663_s16, %s2464_s16   ;;  %s1615_s15 = sphi %s1661_s15, %s2463_s15  }
   0x6   : > { %s1686_s21 = sadd.s32 1, %s1627_s18   ;;  %s74_s22 = sadd.s32 1, %s1623_s17 }
   0x7   : > { %s71_s23 = ssub.s32 %s1627_s18, %s1686_s21  ;;  %p81_p0 = scmp.ne.s32.totalorder %s1623_s17, %s1619_s16 }
   0x8   : > { %p72_p1 = scmp.eq.s32.totalorder %s71_s23, 0  ;;  %p82_p2 = scmp.eq.s32.totalorder %s1627_s18, 0 }
   0x9   : > { %p87_p3 = scmp.ne.s32.totalorder %s1619_s16, %s1615_s15  ;;  %p88_p4 = scmp.eq.s32.totalorder %s1682_s19, 0 }
   0xa   : > { %s1698_s24 = scalar_select %p72_p1, %s1623_s17, %s74_s22  }
   0xb   : > { %p1700_p5 = por %p82_p2, %p81_p0  ;;  %p1704_p6 = por %p88_p4, %p87_p3 }
   0xc   : > { %p132_p7 = scmp.eq.s32.totalorder %s1682_s19, 1  ;;  %p138_p8 = scmp.eq.s32.totalorder %s1234_s20, 1 }
   0xd   : > { %p1378_p10 = scmp.lt.s32.totalorder %s1627_s18, 2  ;;  %s173_s29 = sand.u32 1, %s1623_s17  }
   0xe   : > { %p1711_p11 = por %p132_p7, %p81_p0  ;;  %p1715_p12 = por %p138_p8, %p87_p3 }
   0xf   : > { %s1284_s30 = sshll.u32 %s1627_s18, 12  ;;  %s1237_s5 = sshll.u32 %s173_s29, 8 }
  0x10   : > { %s2457_s27 = scalar_select %p1711_p11, 1, 0 }
  0x11   : > { %s2458_s28 = scalar_select %p1715_p12, 1, 0 }
  0x12   : > { %s1724_s8 = scalar_lea.hbm %s2451_s2, %s1284_s30  ;;  %s177_s9 = scalar_lea.vmem [#allocation2], %s1237_s5 }
  0x13   : > { %s185_s10 = sshll.u32 %s177_s9, 4  ;;  %p1728_p13 = pnand %p1378_p10, %p1700_p5  ;;  %s1732_s10 = int_to_ptr.vmem [resolvable:$true] %s185_s10 }
  0x14   : > { %s1734_s12 = scalar_lea.sflag [#allocation3], %s173_s29  ;;  %s1531_s13 = scalar_lea.hbm %s1724_s8, 4096 }
  0x15   : > { %p1532_p0 = scmp.ne.s32.totalorder %s1724_s8, %s1531_s13  ;;  %p1533_p1 = pneg %p1728_p13 }
  0x16   : > { %s1536_s22 = scalar_lea.hbm %s2451_s2, 8192  ;;  %p1537_p4 = scmp.lt.u32.totalorder %s1724_s8, %s2451_s2 }
  0x17   : > { %p1534_p2 = pnand %p1533_p1, %p1532_p0  ;;  %p1538_p5 = scmp.lt.u32.totalorder %s1536_s22, %s1531_s13 }
  0x18   : > { %p1540_p8 = scmp.lt.u32.totalorder %s1531_s13, %s1724_s8 }
  0x19   : > { %p1535_p3 = pneg %p1534_p2  ;;  %p1539_p7 = por %p1538_p5, %p1537_p4 }
  0x1b   : > { %p1541_p10 = por %p1540_p8, %p1539_p7 }
  0x1d   : > { %p1542_p9 = pnand %p1541_p10, %p1535_p3 }
  0x1f   : > { %1545 = shalt.err (!%p1542_p9)
}
  0x20   : > { %s1546_s29 = scalar_lea.vmem %s1732_s10, 4096  ;;  %s1629_s30 = smov [#allocation2]  }
  0x21   : > { %p1547_p0 = scmp.ne.s32.totalorder %s1732_s10, %s1546_s29  ;;  %s1551_s5 = sshll.u32 %s1629_s30, 4  ;;  %s1552_s5 = int_to_ptr.vmem [resolvable:$false] %s1551_s5 }
  0x22   : > { %s1553_s6 = scalar_lea.vmem %s1552_s5, 8192  ;;  %p1554_p11 = scmp.lt.s32.totalorder %s1732_s10, %s1552_s5 }
  0x23   : > { %p1549_p2 = pnand %p1547_p0, %p1533_p1  ;;  %p1555_p4 = scmp.lt.s32.totalorder %s1553_s6, %s1546_s29 }
  0x25   : > { %p1550_p12 = pneg %p1549_p2  ;;  %p1556_p5 = por %p1555_p4, %p1554_p11 }
  0x27   : > { %p1557_p7 = pnand %p1556_p5, %p1550_p12 }
  0x29   : > { %1560 = shalt.err (!%p1557_p7)
}
  0x2a   : > { %s1630_s7 = smov 256   ;;  %s1631_s9 = smov 16  }
  0x2b   : > { %1373 = dma.hbm_to_vmem [thread:$0]  (!%p1728_p13), %s1724_s8, 4096, %s1732_s10, %s1734_s12, %s1630_s7, %s1630_s7, %s1631_s9  }
  0x2c   : > { %p1241_p9 = scmp.ge.s32.totalorder %s1627_s18, 1  ;;  %p193_p1 = scmp.lt.s32.totalorder %s1627_s18, 3 }
  0x2e   : > { %p194_p3 = pnand %p1241_p9, %p193_p1 }
  0x2f   : > { %s1765_s13 = sand.u32 (!%p194_p3), 1, %s1619_s16  }
  0x30   : > { %197 = sbr.rel (%p194_p3) target bundleno = 657 (0x291), region = 36  ;;  %s1242_s14 = sshll.u32 (!%p194_p3), %s1765_s13, 8 }
  0x31   : > { %s200_s20 = scalar_lea.sflag (!%p194_p3), [#allocation3], %s1765_s13  ;;  %s1769_s22 = scalar_lea.vmem (!%p194_p3), [#allocation2], %s1242_s14 }
  0x37   : > { %1606 = dma.done.wait (%p1704_p6), %s200_s20, 4096  }
  0x38   : > { %1608 = vsyncadd (%p1704_p6), %s200_s20, 4294963200  ;;  %s1244_s8 = sshll.u32 %s1682_s19, 4  ;;  %v1632_v0 = vmov 0   ;;  %v1419_v17 = vld [vmem:[%s2452_s3 + $0x40] sm:$0xff]   ;;  %v1421_v19 = vld [vmem:[%s2452_s3 + $0x48] sm:$0xff]   ;;  %v404_v22 = vlaneseq  ;;  %s1285_s5 = sshll.u32 %s1682_s19, 11 }
  0x39   : > { %1418 = vset.pattern.permute.xlu1 %v1632_v0  ;;  %1417 = vset.pattern.permute.xlu0 %v1632_v0  ;;  %p234_p11 = scmp.lt.s32.totalorder %s1244_s8, 31  ;;  %v1420_v18 = vld [vmem:[%s2452_s3] sm:$0xff]   ;;  %v1422_v20 = vld [vmem:[%s2452_s3 + $0x8] sm:$0xff]   ;;  %v1423_v21 = vld [vmem:[%s2452_s3 + $0x50] sm:$0xff]   ;;  %s2402_s14 = scalar_lea.hbm %s2453_s4, %s1285_s5 }
  0x3a   : > { %1286 = vmatprep.subr.bf16.mxu0 %v1419_v17  ;;  %1350 = vmatprep.subr.bf16.mxu1 %v1419_v17  ;;  %v405_v23 = vshrl.u32 %v404_v22, 7  ;;  %v258_v26 = vld [vmem:[%s2450_s1] sm:$0x3]  ;;  %v260_v36 = vld [vmem:[%s1769_s22 + $0x8] sm:$0xff]  ;;  %v1814_v44 = vld [vmem:[%s1769_s22 + $0x10] sm:$0xff]  ;;  %s1136_s19 = scalar_lea.sflag [#allocation4], %s1765_s13 }
  0x3b   : > { %s2468_s8 = smov (!%p234_p11, %s1244_s8), 31  ;;  %1287 = vmatpush3.bf16.msra.mxu0 %v1420_v18  ;;  %1358 = vmatpush3.bf16.msra.mxu1 %v1420_v18  ;;  %v259_v35 = vld [vmem:[%s1769_s22] sm:$0xff]  ;;  %v1811_v38 = vld [vmem:[%s1769_s22 + $0x88] sm:$0xff]  ;;  %vm511_vm1 = vcmp.gt.f32.partialorder %v260_v36, 0.0  ;;  %v262_v51 = vld [vmem:[%s1769_s22 + $0x18] sm:$0xff]  ;;  %vm512_vm4 = vcmp.gt.f32.partialorder %v1814_v44, 0.0 }
  0x3c   : > { %s1245_s10 = sshll.u32 %s2468_s8, 3  ;;  %1288 = vmatprep.subr.bf16.mxu0 %v1421_v19  ;;  %1351 = vmatprep.subr.bf16.mxu1 %v1421_v19  ;;  %v406_v24 = vsub.s32 0, %v405_v23  ;;  %v410_v25 = vsub.s32 1, %v405_v23  ;;  %v275_v37 = vld [vmem:[%s1769_s22 + $0x80] sm:$0xff]  ;;  %vm510_vm0 = vcmp.gt.f32.partialorder %v259_v35, 0.0  ;;  %vm527_vm3 = vcmp.gt.f32.partialorder %v1811_v38, 0.0 }
  0x3d   : > { %s237_s23 = scalar_lea.vmem %s2449_s0, %s1245_s10  ;;  %vm526_vm2 = vcmp.gt.f32.partialorder %v275_v37, 0.0  ;;  %v1828_v52 = vld [vmem:[%s1769_s22 + $0x90] sm:$0xff]  ;;  %v1835_v55 = vld [vmem:[%s1769_s22 + $0x98] sm:$0xff]  ;;  %v1838_v56 = vld [vmem:[%s1769_s22 + $0x20] sm:$0xff]  ;;  %vm513_vm5 = vcmp.gt.f32.partialorder %v262_v51, 0.0  ;;  %p2460_p12 = scmp.ne.s32.totalorder %s2457_s27, 0 }
  0x3e   : > { %v250_v1 = vld [vmem:[%s237_s23 + $0x40] sm:$0xff]  ;;  %v251_v3 = vld [vmem:[%s237_s23 + $0x48] sm:$0xff]  ;;  %v245_v5 = vld [vmem:[%s237_s23 + $0x18] sm:$0xff]  ;;  %v1797_v27 = vrot.slane %v258_v26, %v406_v24  ;;  %v1799_v28 = vrot.slane %v258_v26, %v410_v25  ;;  %vm528_vm6 = vcmp.gt.f32.partialorder %v1828_v52, 0.0  ;;  %vm529_vm7 = vcmp.gt.f32.partialorder %v1835_v55, 0.0  ;;  %s1633_s8 = smov [#allocation5]  }
  0x3f   : > { %v242_v2 = vld [vmem:[%s237_s23] sm:$0xff]  ;;  %365 = vperm.xlu1 %1418, %v250_v1   ;;  %v243_v4 = vld [vmem:[%s237_s23 + $0x8] sm:$0xff]  ;;  %v244_v6 = vld [vmem:[%s237_s23 + $0x10] sm:$0xff]  ;;  %1289 = vmatpush3.bf16.msra.mxu0 %v1422_v20  ;;  %vm514_vm8 = vcmp.gt.f32.partialorder %v1838_v56, 0.0  ;;  %s1565_s10 = sshll.u32 %s1633_s8, 4  ;;  %s1566_s10 = int_to_ptr.vmem [resolvable:$false] %s1565_s10 }
  0x40   : > { %325 = vperm.xlu0 %1417, %v242_v2   ;;  %v253_v7 = vld [vmem:[%s237_s23 + $0x58] sm:$0xff]  ;;  %v252_v8 = vld [vmem:[%s237_s23 + $0x50] sm:$0xff]  ;;  %v247_v9 = vld [vmem:[%s237_s23 + $0x28] sm:$0xff]  ;;  %1359 = vmatpush3.bf16.msra.mxu1 %v1422_v20  ;;  %s1567_s11 = scalar_lea.vmem %s1566_s10, 4096 }
  0x41   : > { %v246_v10 = vld [vmem:[%s237_s23 + $0x20] sm:$0xff]  ;;  %v255_v11 = vld [vmem:[%s237_s23 + $0x68] sm:$0xff]  ;;  %v249_v13 = vld [vmem:[%s237_s23 + $0x38] sm:$0xff]  ;;  %1290 = vmatprep.subr.bf16.mxu0 %v1423_v21  ;;  %1352 = vmatprep.subr.bf16.mxu1 %v1423_v21 }
  0x42   : > { %v254_v12 = vld [vmem:[%s237_s23 + $0x60] sm:$0xff]  ;;  %v248_v14 = vld [vmem:[%s237_s23 + $0x30] sm:$0xff]  ;;  %v257_v15 = vld [vmem:[%s237_s23 + $0x78] sm:$0xff] }
  0x43   : > { %370 = vperm.xlu1 %1418, %v251_v3   ;;  %v256_v16 = vld [vmem:[%s237_s23 + $0x70] sm:$0xff]  ;;  %v1841_v57 = vld [vmem:[%s1769_s22 + $0x28] sm:$0xff] }
  0x44   : > { %330 = vperm.xlu0 %1417, %v243_v4   ;;  %vm515_vm9 = vcmp.gt.f32.partialorder %v1841_v57, 0.0  ;;  %v1886_v17 = vld [vmem:[%s1769_s22 + $0xa8] sm:$0xff]  ;;  %v1911_v26 = vld [vmem:[%s1769_s22 + $0xb0] sm:$0xff] }
  0x45   : > { %vm531_vm13 = vcmp.gt.f32.partialorder %v1886_v17, 0.0  ;;  %vm532_vm14 = vcmp.gt.f32.partialorder %v1911_v26, 0.0 }
  0x47   : > { %340 = vperm.xlu1 %1418, %v245_v5   ;;  %v1862_v5 = vld [vmem:[%s1769_s22 + $0x30] sm:$0xff] }
  0x48   : > { %335 = vperm.xlu0 %1417, %v244_v6   ;;  %v1865_v6 = vld [vmem:[%s1769_s22 + $0x38] sm:$0xff]  ;;  %vm516_vm10 = vcmp.gt.f32.partialorder %v1862_v5, 0.0 }
  0x49   : > { %vm517_vm11 = vcmp.gt.f32.partialorder %v1865_v6, 0.0  ;;  %v2073_v6 = vld [vmem:[%s1769_s22 + $0x70] sm:$0xff] }
  0x4b   : > { %380 = vperm.xlu1 %1418, %v253_v7  }
  0x4c   : > { %375 = vperm.xlu0 %1417, %v252_v8  }
  0x4f   : > { %350 = vperm.xlu1 %1418, %v247_v9  }
  0x50   : > { %345 = vperm.xlu0 %1417, %v246_v10  }
  0x53   : > { %390 = vperm.xlu1 %1418, %v255_v11  }
  0x54   : > { %385 = vperm.xlu0 %1417, %v254_v12  }
  0x57   : > { %360 = vperm.xlu1 %1418, %v249_v13  }
  0x58   : > { %355 = vperm.xlu0 %1417, %v248_v14  }
  0x5b   : > { %400 = vperm.xlu1 %1418, %v257_v15  }
  0x5c   : > { %395 = vperm.xlu0 %1417, %v256_v16   ;;  %v1883_v16 = vld [vmem:[%s1769_s22 + $0xa0] sm:$0xff] }
  0x5d   : > { %vm530_vm12 = vcmp.gt.f32.partialorder %v1883_v16, 0.0 }
  0xbe   : > { %v366_v29 = vpop.permute.xlu1 %365 }
  0xbf   : > { %v326_v30 = vpop.permute.xlu0 %325  ;;  %v430_v31 = vadd.f32 %v1797_v27, %v366_v29  ;;  %v1803_v32 = vadd.f32 %v1799_v28, %v366_v29  ;;  %v1914_v29 = vld [vmem:[%s1769_s22 + $0xb8] sm:$0xff] }
  0xc0   : > { %v414_v33 = vadd.f32 %v1797_v27, %v326_v30  ;;  %v415_v34 = vadd.f32 %v1799_v28, %v326_v30  ;;  %v1917_v30 = vld [vmem:[%s1769_s22 + $0x40] sm:$0xff]  ;;  %vm533_vm15 = vcmp.gt.f32.partialorder %v1914_v29, 0.0 }
  0xc1   : > { %v462_v39 = vmul.f32 0.2, %v430_v31  ;;  %v463_v45 = vmul.f32 0.2, %v1803_v32 }
  0xc2   : > { %v446_v40 = vmul.f32 0.2, %v414_v33  ;;  %v447_v41 = vmul.f32 0.2, %v415_v34  ;;  %v371_v42 = vpop.permute.xlu1 %370 }
  0xc3   : > { %v331_v43 = vpop.permute.xlu0 %330  ;;  %v1818_v46 = vadd.f32 %v1797_v27, %v371_v42  ;;  %v1822_v48 = vadd.f32 %v1799_v28, %v371_v42  ;;  %v494_v53 = vmax.f32 %v430_v31, %v462_v39  ;;  %v495_v2 = vmax.f32 %v1803_v32, %v463_v45  ;;  %v1957_v45 = vld [vmem:[%s1769_s22 + $0x48] sm:$0xff] }
  0xc4   : > { %v478_v47 = vmax.f32 %v414_v33, %v446_v40  ;;  %v416_v49 = vadd.f32 %v1797_v27, %v331_v43  ;;  %v417_v50 = vadd.f32 %v1799_v28, %v331_v43  ;;  %v479_v58 = vmax.f32 %v415_v34, %v447_v41 }
  0xc5   : > { %v1831_v54 = vmul.f32 0.2, %v1818_v46  ;;  %v1844_v59 = vmul.f32 0.2, %v1822_v48  ;;  %v1880_v15 = vsel %vm526_vm2, %v494_v53, -9e+15 }
  0xc6   : > { %v448_v60 = vmul.f32 0.2, %v416_v49  ;;  %v449_v61 = vmul.f32 0.2, %v417_v50  ;;  %v341_v62 = vpop.permute.xlu1 %340  ;;  %v1858_v4 = vsel %vm510_vm0, %v478_v47, -9e+15 }
  0xc7   : > { %v336_v63 = vpop.permute.xlu0 %335  ;;  %v1847_v0 = vadd.f32 %v1797_v27, %v341_v62  ;;  %v1868_v9 = vadd.f32 %v1799_v28, %v341_v62  ;;  %v496_v10 = vmax.f32 %v1818_v46, %v1831_v54  ;;  %v497_v11 = vmax.f32 %v1822_v48, %v1844_v59  ;;  %v1980_v59 = vld [vmem:[%s1769_s22 + $0x58] sm:$0xff] }
  0xc8   : > { %v1850_v1 = vadd.f32 %v1797_v27, %v336_v63  ;;  %v1855_v3 = vadd.f32 %v1799_v28, %v336_v63  ;;  %v480_v7 = vmax.f32 %v416_v49, %v448_v60  ;;  %v481_v8 = vmax.f32 %v417_v50, %v449_v61  ;;  %v1983_v60 = vld [vmem:[%s1769_s22 + $0xc0] sm:$0xff] }
  0xc9   : > { %v1877_v12 = vsel %vm511_vm1, %v479_v58, -9e+15  ;;  %v1889_v18 = vmul.f32 0.2, %v1847_v0  ;;  %v1908_v25 = vsel %vm527_vm3, %v495_v2, -9e+15 }
  0xca   : > { %v381_v13 = vpop.permute.xlu1 %380  ;;  %v450_v19 = vmul.f32 0.2, %v1850_v1  ;;  %v451_v20 = vmul.f32 0.2, %v1855_v3  ;;  %v574_v21 = vmax.f32 %v1858_v4, %v1877_v12  ;;  %v1920_v31 = vmul.f32 0.2, %v1868_v9 }
  0xcb   : > { %v376_v14 = vpop.permute.xlu0 %375  ;;  %v1898_v22 = vadd.f32 %v1797_v27, %v381_v13  ;;  %v1901_v23 = vadd.f32 %v1799_v28, %v381_v13  ;;  %v1927_v33 = vsel %vm512_vm4, %v480_v7, -9e+15  ;;  %v1930_v34 = vsel %vm513_vm5, %v481_v8, -9e+15  ;;  %v1977_v58 = vld [vmem:[%s1769_s22 + $0x50] sm:$0xff] }
  0xcc   : > { %v1904_v24 = vadd.f32 %v1797_v27, %v376_v14  ;;  %575 = vmax.xlane.f32.xlu0 %v574_v21  ;;  %v1923_v32 = vadd.f32 %v1799_v28, %v376_v14  ;;  %v577_v38 = vmax.f32 %v1927_v33, %v1930_v34  ;;  %v598_v41 = vmax.f32 %v1880_v15, %v1908_v25  ;;  %v2024_v14 = vld [vmem:[%s1769_s22 + $0xd0] sm:$0xff]  ;;  %v2044_v21 = vld [vmem:[%s1769_s22 + $0x60] sm:$0xff] }
  0xcd   : > { %v1935_v35 = vmul.f32 0.2, %v1898_v22  ;;  %v1938_v36 = vmul.f32 0.2, %v1901_v23  ;;  %v482_v46 = vmax.f32 %v1850_v1, %v450_v19  ;;  %v483_v47 = vmax.f32 %v1855_v3, %v451_v20  ;;  %v2000_v3 = vld [vmem:[%s1769_s22 + $0xc8] sm:$0xff] }
  0xce   : > { %v1941_v37 = vmul.f32 0.2, %v1904_v24  ;;  %v351_v39 = vpop.permute.xlu1 %350  ;;  %v467_v48 = vmul.f32 0.2, %v1923_v32  ;;  %578 = vmax.xlane.f32.xlu1 %v577_v38  ;;  %vm518_vm0 = vcmp.gt.f32.partialorder %v1917_v30, 0.0  ;;  %v484_v50 = vmax.f32 %v1847_v0, %v1889_v18  ;;  %v2027_v18 = vld [vmem:[%s1769_s22 + $0xd8] sm:$0xff] }
  0xcf   : > { %v346_v40 = vpop.permute.xlu0 %345  ;;  %v1948_v42 = vadd.f32 %v1797_v27, %v351_v39  ;;  %v1951_v43 = vadd.f32 %v1799_v28, %v351_v39  ;;  %v485_v51 = vmax.f32 %v1868_v9, %v1920_v31  ;;  %v500_v53 = vmax.f32 %v1898_v22, %v1935_v35 }
  0xd0   : > { %v1954_v44 = vadd.f32 %v1797_v27, %v346_v40  ;;  %v1963_v49 = vadd.f32 %v1799_v28, %v346_v40  ;;  %v501_v54 = vmax.f32 %v1901_v23, %v1938_v36  ;;  %599 = vmax.xlane.f32.xlu0 %v598_v41  ;;  %v498_v61 = vmax.f32 %v1904_v24, %v1941_v37  ;;  %v2047_v24 = vld [vmem:[%s1769_s22 + $0x68] sm:$0xff] }
  0xd1   : > { %v1988_v62 = vmul.f32 0.2, %v1948_v42  ;;  %v1992_v63 = vsel %vm528_vm6, %v496_v10, -9e+15  ;;  %v1996_v0 = vsel %vm529_vm7, %v497_v11, -9e+15  ;;  %v499_v9 = vmax.f32 %v1923_v32, %v467_v48 }
  0xd2   : > { %v391_v1 = vpop.permute.xlu1 %390  ;;  %vm519_vm1 = vcmp.gt.f32.partialorder %v1957_v45, 0.0  ;;  %v2003_v7 = vmul.f32 0.2, %v1951_v43  ;;  %v454_v8 = vmul.f32 0.2, %v1954_v44  ;;  %v601_v55 = vmax.f32 %v1992_v63, %v1996_v0  ;;  %v2076_v48 = vld [vmem:[%s1769_s22 + $0x78] sm:$0xff] }
  0xd3   : > { %v386_v2 = vpop.permute.xlu0 %385  ;;  %v2007_v52 = vmul.f32 0.2, %v1963_v49  ;;  %v2014_v10 = vsel %vm514_vm8, %v482_v46, -9e+15  ;;  %v2018_v11 = vsel %vm515_vm9, %v483_v47, -9e+15  ;;  %v2021_v13 = vadd.f32 %v1797_v27, %v391_v1 }
  0xd4   : > { %602 = vmax.xlane.f32.xlu0 %v601_v55  ;;  %v580_v19 = vmax.f32 %v2014_v10, %v2018_v11  ;;  %v2032_v20 = vadd.f32 %v1799_v28, %v391_v1  ;;  %v2035_v56 = vadd.f32 %v1797_v27, %v386_v2  ;;  %v2038_v57 = vadd.f32 %v1799_v28, %v386_v2 }
  0xd5   : > { %vm520_vm2 = vcmp.gt.f32.partialorder %v1977_v58, 0.0  ;;  %vm521_vm3 = vcmp.gt.f32.partialorder %v1980_v59, 0.0  ;;  %vm534_vm4 = vcmp.gt.f32.partialorder %v1983_v60, 0.0  ;;  %v488_v31 = vmax.f32 %v1948_v42, %v1988_v62 }
  0xd6   : > { %v2052_v32 = vmul.f32 0.2, %v2021_v13  ;;  %v2056_v37 = vsel %vm516_vm10, %v484_v50, -9e+15  ;;  %v2060_v38 = vsel %vm517_vm11, %v485_v51, -9e+15  ;;  %v361_v39 = vpop.permute.xlu1 %360  ;;  %v489_v41 = vmax.f32 %v1951_v43, %v2003_v7  ;;  %581 = vmax.xlane.f32.xlu1 %v580_v19 }
  0xd7   : > { %v356_v40 = vpop.permute.xlu0 %355  ;;  %v486_v46 = vmax.f32 %v1954_v44, %v454_v8  ;;  %v487_v47 = vmax.f32 %v1963_v49, %v2007_v52  ;;  %v583_v5 = vmax.f32 %v2056_v37, %v2060_v38  ;;  %vm535_vm5 = vcmp.gt.f32.partialorder %v2000_v3, 0.0  ;;  %v2079_v43 = vld [vmem:[%s1769_s22 + $0xe0] sm:$0xff]  ;;  %v1426_v3 = vld [vmem:[%s2452_s3 + $0x18] sm:$0xff]  }
  0xd8   : > { %vm536_vm6 = vcmp.gt.f32.partialorder %v2024_v14, 0.0  ;;  %vm537_vm7 = vcmp.gt.f32.partialorder %v2027_v18, 0.0  ;;  %v470_v44 = vmul.f32 0.2, %v2035_v56  ;;  %v2084_v49 = vsel %vm530_vm12, %v498_v61, -9e+15 }
  0xd9   : > { %v2088_v50 = vsel %vm531_vm13, %v499_v9, -9e+15  ;;  %v2091_v51 = vadd.f32 %v1797_v27, %v361_v39  ;;  %v473_v1 = vmul.f32 0.2, %v2032_v20  ;;  %v504_v2 = vmax.f32 %v2021_v13, %v2052_v32  ;;  %584 = vmax.xlane.f32.xlu0 %v583_v5 }
  0xda   : > { %v471_v7 = vmul.f32 0.2, %v2038_v57  ;;  %v604_v16 = vmax.f32 %v2084_v49, %v2088_v50  ;;  %vm522_vm8 = vcmp.gt.f32.partialorder %v2044_v21, 0.0  ;;  %vm523_vm9 = vcmp.gt.f32.partialorder %v2047_v24, 0.0  ;;  %v401_v55 = vpop.permute.xlu1 %400 }
  0xdb   : > { %v2102_v17 = vadd.f32 %v1799_v28, %v361_v39  ;;  %v2105_v61 = vmul.f32 0.2, %v2091_v51  ;;  %v426_v8 = vadd.f32 %v1797_v27, %v356_v40  ;;  %v427_v52 = vadd.f32 %v1799_v28, %v356_v40  ;;  %v396_v23 = vpop.permute.xlu0 %395  ;;  %v1425_v39 = vld [vmem:[%s2452_s3 + $0x58] sm:$0xff]  }
  0xdc   : > { %vm524_vm10 = vcmp.gt.f32.partialorder %v2073_v6, 0.0  ;;  %vm525_vm11 = vcmp.gt.f32.partialorder %v2076_v48, 0.0  ;;  %605 = vmax.xlane.f32.xlu1 %v604_v16  ;;  %v2116_v9 = vsel %vm532_vm14, %v500_v53, -9e+15  ;;  %v2123_v13 = vsel %vm533_vm15, %v501_v54, -9e+15 }
  0xdd   : > { %v2127_v19 = vsel %vm518_vm0, %v486_v46, -9e+15  ;;  %v2130_v32 = vadd.f32 %v1797_v27, %v401_v55  ;;  %vm538_vm12 = vcmp.gt.f32.partialorder %v2079_v43, 0.0  ;;  %v502_v22 = vmax.f32 %v2035_v56, %v470_v44  ;;  %v1424_v56 = vld [vmem:[%s2452_s3 + $0x10] sm:$0xff]   ;;  %v288_v16 = vld [vmem:[%s1769_s22 + $0xe8] sm:$0xff]  ;;  %v1427_v6 = vld [vmem:[%s2452_s3 + $0x60] sm:$0xff]  }
  0xde   : > { %v461_v26 = vmul.f32 0.2, %v2102_v17  ;;  %v458_v35 = vmul.f32 0.2, %v426_v8  ;;  %v459_v53 = vmul.f32 0.2, %v427_v52  ;;  %v505_v29 = vmax.f32 %v2032_v20, %v473_v1  ;;  %1291 = vmatpush3.bf16.msra.mxu0 %v1424_v56  ;;  %1360 = vmatpush3.bf16.msra.mxu1 %v1424_v56 }
  0xdf   : > { %v607_v30 = vmax.f32 %v2116_v9, %v2123_v13  ;;  %v2140_v36 = vsel %vm519_vm1, %v487_v47, -9e+15  ;;  %v2143_v54 = vadd.f32 %v1799_v28, %v401_v55  ;;  %v503_v20 = vmax.f32 %v2038_v57, %v471_v7  ;;  %1292 = vmatprep.subr.bf16.mxu0 %v1425_v39  ;;  %1353 = vmatprep.subr.bf16.mxu1 %v1425_v39  ;;  %v1428_v48 = vld [vmem:[%s2452_s3 + $0x20] sm:$0xff]   ;;  %v1431_v39 = vld [vmem:[%s2452_s3 + $0x70] sm:$0xff]  }
  0xe0   : > { %v492_v40 = vmax.f32 %v2091_v51, %v2105_v61  ;;  %v493_v45 = vmax.f32 %v2102_v17, %v461_v26  ;;  %v586_v46 = vmax.f32 %v2127_v19, %v2140_v36  ;;  %v490_v47 = vmax.f32 %v426_v8, %v458_v35  ;;  %v290_v61 = vld [vmem:[%s1769_s22 + $0xf8] sm:$0xff] }
  0xe1   : > { %608 = vmax.xlane.f32.xlu0 %v607_v30  ;;  %v476_v5 = vmul.f32 0.2, %v2130_v32  ;;  %v442_v44 = vadd.f32 %v1797_v27, %v396_v23  ;;  %v443_v1 = vadd.f32 %v1799_v28, %v396_v23  ;;  %v491_v55 = vmax.f32 %v427_v52, %v459_v53  ;;  %v1429_v30 = vld [vmem:[%s2452_s3 + $0x68] sm:$0xff]  }
  0xe2   : > { %587 = vmax.xlane.f32.xlu1 %v586_v46  ;;  %v2166_v57 = vsel %vm520_vm2, %v488_v31, -9e+15  ;;  %v2170_v51 = vsel %vm521_vm3, %v489_v41, -9e+15  ;;  %v2174_v27 = vsel %vm534_vm4, %v502_v22, -9e+15  ;;  %1293 = vmatpush3.bf16.msra.mxu0 %v1426_v3 }
  0xe3   : > { %v477_v28 = vmul.f32 0.2, %v2143_v54  ;;  %v474_v7 = vmul.f32 0.2, %v442_v44  ;;  %v475_v17 = vmul.f32 0.2, %v443_v1  ;;  %v589_v42 = vmax.f32 %v2166_v57, %v2170_v51  ;;  %1361 = vmatpush3.bf16.msra.mxu1 %v1426_v3  ;;  %1294 = vmatprep.subr.bf16.mxu0 %v1427_v6 }
  0xe4   : > { %v2181_v58 = vsel %vm535_vm5, %v503_v20, -9e+15  ;;  %v2185_v59 = vsel %vm536_vm6, %v504_v2, -9e+15  ;;  %v2189_v60 = vsel %vm537_vm7, %v505_v29, -9e+15  ;;  %v508_v24 = vmax.f32 %v2130_v32, %v476_v5  ;;  %1354 = vmatprep.subr.bf16.mxu1 %v1427_v6 }
  0xe5   : > { %v506_v62 = vmax.f32 %v442_v44, %v474_v7  ;;  %v507_v31 = vmax.f32 %v443_v1, %v475_v17  ;;  %590 = vmax.xlane.f32.xlu0 %v589_v42  ;;  %v610_v41 = vmax.f32 %v2174_v27, %v2181_v58  ;;  %vm539_vm13 = vcmp.gt.f32.partialorder %v288_v16, 0.0  ;;  %v289_v2 = vld [vmem:[%s1769_s22 + $0xf0] sm:$0xff]  ;;  %s1243_s22 = sshll.u32 %s1765_s13, 7 }
  0xe6   : > { %v2198_v14 = vsel %vm522_vm8, %v490_v47, -9e+15  ;;  %v2202_v18 = vsel %vm523_vm9, %v491_v55, -9e+15  ;;  %v613_v8 = vmax.f32 %v2185_v59, %v2189_v60  ;;  %v2212_v22 = vsel %vm524_vm10, %v492_v40, -9e+15  ;;  %1295 = vmatpush3.bf16.msra.mxu0 %v1428_v48 }
  0xe7   : > { %611 = vmax.xlane.f32.xlu1 %v610_v41  ;;  %v592_v52 = vmax.f32 %v2198_v14, %v2202_v18  ;;  %v2216_v21 = vsel %vm525_vm11, %v493_v45, -9e+15  ;;  %v509_v26 = vmax.f32 %v2143_v54, %v477_v28  ;;  %v2222_v35 = vsel %vm538_vm12, %v506_v62, -9e+15  ;;  %1362 = vmatpush3.bf16.msra.mxu1 %v1428_v48  ;;  %v1430_v54 = vld [vmem:[%s2452_s3 + $0x28] sm:$0xff]   ;;  %v1432_v20 = vld [vmem:[%s2452_s3 + $0x30] sm:$0xff]  }
  0xe8   : > { %v2224_v53 = vsel %vm539_vm13, %v507_v31, -9e+15  ;;  %vm540_vm14 = vcmp.gt.f32.partialorder %v289_v2, 0.0  ;;  %vm541_vm15 = vcmp.gt.f32.partialorder %v290_v61, 0.0  ;;  %v595_v43 = vmax.f32 %v2212_v22, %v2216_v21  ;;  %1296 = vmatprep.subr.bf16.mxu0 %v1429_v30  ;;  %1355 = vmatprep.subr.bf16.mxu1 %v1429_v30  ;;  %v1433_v40 = vld [vmem:[%s2452_s3 + $0x78] sm:$0xff]   ;;  %s2338_s30 = scalar_lea.vmem [#allocation5], %s1243_s22 }
  0xe9   : > { %614 = vmax.xlane.f32.xlu0 %v613_v8  ;;  %v616_v32 = vmax.f32 %v2222_v35, %v2224_v53  ;;  %v2236_v23 = vsel %vm540_vm14, %v508_v24, -9e+15  ;;  %v2238_v29 = vsel %vm541_vm15, %v509_v26, -9e+15  ;;  %v1434_v45 = vld [vmem:[%s2452_s3 + $0x38] sm:$0xff]   ;;  %s1149_s6 = sshll.u32 %s2338_s30, 4  ;;  %s2404_s6 = int_to_ptr.vmem [resolvable:$true] %s1149_s6 }
  0xea   : > { %v619_v56 = vmax.f32 %v2236_v23, %v2238_v29  ;;  %1297 = vmatpush3.bf16.msra.mxu0 %v1430_v54  ;;  %s1561_s20 = scalar_lea.vmem %s2404_s6, 2048  ;;  %p1568_p10 = scmp.lt.s32.totalorder %s2404_s6, %s1566_s10 }
  0xeb   : > { %593 = vmax.xlane.f32.xlu1 %v592_v52  ;;  %1363 = vmatpush3.bf16.msra.mxu1 %v1430_v54  ;;  %p1562_p6 = scmp.ne.s32.totalorder %s2404_s6, %s1561_s20  ;;  %p1569_p0 = scmp.lt.s32.totalorder %s1567_s11, %s1561_s20 }
  0xec   : > { %1298 = vmatprep.subr.bf16.mxu0 %v1431_v39  ;;  %1356 = vmatprep.subr.bf16.mxu1 %v1431_v39 }
  0xed   : > { %596 = vmax.xlane.f32.xlu0 %v595_v43  ;;  %p1563_p13 = pnand %p1562_p6, %p2460_p12  ;;  %p1570_p2 = por %p1569_p0, %p1568_p10 }
  0xee   : > { %1299 = vmatpush3.bf16.msra.mxu0 %v1432_v20 }
  0xef   : > { %617 = vmax.xlane.f32.xlu1 %v616_v32  ;;  %1364 = vmatpush3.bf16.msra.mxu1 %v1432_v20  ;;  %p1564_p8 = pneg %p1563_p13 }
  0xf0   : > { %1300 = vmatprep.subr.bf16.mxu0 %v1433_v40  ;;  %1357 = vmatprep.subr.bf16.mxu1 %v1433_v40 }
  0xf1   : > { %620 = vmax.xlane.f32.xlu0 %v619_v56  ;;  %p1571_p4 = pnand %p1570_p2, %p1564_p8 }
  0xf2   : > { %1301 = vmatpush3.bf16.msra.mxu0 %v1434_v45 }
  0xf3   : > { %1365 = vmatpush3.bf16.msra.mxu1 %v1434_v45 }
 0x159   : > { %v576_v46 = vpop.xlane.xlu0 %575 }
 0x15a   : > { %v622_v5 = vsub.f32 %v1858_v4, %v576_v46  ;;  %v623_v44 = vsub.f32 %v1877_v12, %v576_v46 }
 0x15b   : > { %v579_v47 = vpop.xlane.xlu1 %578 }
 0x15c   : > { %v624_v1 = vsub.f32 %v1927_v33, %v579_v47  ;;  %v625_v16 = vsub.f32 %v1930_v34, %v579_v47 }
 0x15d   : > { %v600_v55 = vpop.xlane.xlu0 %599 }
 0x15e   : > { %v654_v28 = vpack.c.bf16 %v624_v1, %v622_v5  ;;  %v655_v7 = vpack.c.bf16 %v625_v16, %v623_v44  ;;  %v638_v31 = vsub.f32 %v1880_v15, %v600_v55  ;;  %v639_v4 = vsub.f32 %v1908_v25, %v600_v55 }
 0x160   : > { %v671_v17 = vmul.bf16 1069105081, %v654_v28  ;;  %v674_v42 = vmul.bf16 1069105081, %v655_v7 }
 0x161   : > { %v603_v62 = vpop.xlane.xlu0 %602 }
 0x162   : > { %v640_v41 = vsub.f32 %v1992_v63, %v603_v62  ;;  %v641_v3 = vsub.f32 %v1996_v0, %v603_v62  ;;  %1435 = vpow.bf16 %v671_v17 }
 0x163   : > { %v582_v12 = vpop.xlane.xlu1 %581  ;;  %1437 = vpow.bf16 %v674_v42 }
 0x164   : > { %v662_v33 = vpack.c.bf16 %v640_v41, %v638_v31  ;;  %v663_v2 = vpack.c.bf16 %v641_v3, %v639_v4  ;;  %v626_v61 = vsub.f32 %v2014_v10, %v582_v12  ;;  %v627_v15 = vsub.f32 %v2018_v11, %v582_v12 }
 0x166   : > { %v585_v34 = vpop.xlane.xlu0 %584  ;;  %v695_v8 = vmul.bf16 1069105081, %v662_v33  ;;  %v698_v63 = vmul.bf16 1069105081, %v663_v2 }
 0x167   : > { %v628_v52 = vsub.f32 %v2056_v37, %v585_v34  ;;  %v629_v24 = vsub.f32 %v2060_v38, %v585_v34 }
 0x168   : > { %1439 = vpow.bf16 %v695_v8 }
 0x169   : > { %v606_v26 = vpop.xlane.xlu1 %605  ;;  %v656_v0 = vpack.c.bf16 %v628_v52, %v626_v61  ;;  %1441 = vpow.bf16 %v698_v63  ;;  %v657_v25 = vpack.c.bf16 %v629_v24, %v627_v15 }
 0x16a   : > { %v642_v48 = vsub.f32 %v2084_v49, %v606_v26  ;;  %v643_v10 = vsub.f32 %v2088_v50, %v606_v26 }
 0x16b   : > { %v677_v6 = vmul.bf16 1069105081, %v656_v0  ;;  %v680_v43 = vmul.bf16 1069105081, %v657_v25 }
 0x16d   : > { %1443 = vpow.bf16 %v677_v6  ;;  %v1436_v11 = vpop.eup %1435 }
 0x16e   : > { %v609_v32 = vpop.xlane.xlu0 %608  ;;  %1445 = vpow.bf16 %v680_v43  ;;  %v1438_v39 = vpop.eup %1437  ;;  %v720_v45 = vunpack.c.h.bf16 %v1436_v11  ;;  %v718_v49 = vunpack.c.l.bf16 %v1436_v11 }
 0x16f   : > { %v588_v30 = vpop.xlane.xlu1 %587  ;;  %v644_v37 = vsub.f32 %v2116_v9, %v609_v32  ;;  %v645_v38 = vsub.f32 %v2123_v13, %v609_v32  ;;  %942 = vmatprep.mubr.bf16.mxu0 %v1438_v39  ;;  %v721_v44 = vunpack.c.h.bf16 %v1438_v39  ;;  %v719_v1 = vunpack.c.l.bf16 %v1438_v39 }
 0x170   : > { %v630_v20 = vsub.f32 %v2127_v19, %v588_v30  ;;  %v631_v9 = vsub.f32 %v2140_v36, %v588_v30  ;;  %943 = vmatmul.mubr.bf16.vlgmr.msra.gmra.mrb[0].mxu0 %v1436_v11 }
 0x171   : > { %v664_v54 = vpack.c.bf16 %v644_v37, %v642_v48  ;;  %v665_v56 = vpack.c.bf16 %v645_v38, %v643_v10  ;;  %v753_v7 = vadd.f32 %v721_v44, %v720_v45  ;;  %v750_v17 = vadd.f32 %v719_v1, %v718_v49 }
 0x172   : > { %v591_v40 = vpop.xlane.xlu0 %590 }
 0x173   : > { %v701_v46 = vmul.bf16 1069105081, %v664_v54  ;;  %v704_v47 = vmul.bf16 1069105081, %v665_v56  ;;  %v632_v50 = vsub.f32 %v2166_v57, %v591_v40  ;;  %v633_v5 = vsub.f32 %v2170_v51, %v591_v40  ;;  %v2280_v55 = vpop.eup %1439  ;;  %754 = vadd.xlane.f32.xlu0 %v753_v7  ;;  %751 = vadd.xlane.f32.xlu1 %v750_v17 }
 0x174   : > { %v612_v13 = vpop.xlane.xlu1 %611  ;;  %v2282_v42 = vpop.eup %1441  ;;  %v736_v1 = vunpack.c.h.bf16 %v2280_v55 }
 0x175   : > { %1447 = vpow.bf16 %v701_v46  ;;  %v658_v16 = vpack.c.bf16 %v632_v50, %v630_v20  ;;  %v659_v19 = vpack.c.bf16 %v633_v5, %v631_v9  ;;  %v646_v57 = vsub.f32 %v2174_v27, %v612_v13  ;;  %974 = vmatprep.mubr.bf16.mxu1 %v2282_v42 }
 0x176   : > { %1449 = vpow.bf16 %v704_v47  ;;  %v615_v28 = vpop.xlane.xlu0 %614  ;;  %v647_v31 = vsub.f32 %v2181_v58, %v612_v13  ;;  %975 = vmatmul.mubr.bf16.vlgmr.msra.gmra.mrb[0].mxu1 %v2280_v55 }
 0x177   : > { %v683_v51 = vmul.bf16 1069105081, %v658_v16  ;;  %v648_v36 = vsub.f32 %v2185_v59, %v615_v28  ;;  %v649_v62 = vsub.f32 %v2189_v60, %v615_v28  ;;  %v686_v41 = vmul.bf16 1069105081, %v659_v19 }
 0x178   : > { %v594_v3 = vpop.xlane.xlu1 %593  ;;  %v1444_v12 = vpop.eup %1443  ;;  %v737_v16 = vunpack.c.h.bf16 %v2282_v42  ;;  %v734_v19 = vunpack.c.l.bf16 %v2280_v55  ;;  %v735_v28 = vunpack.c.l.bf16 %v2282_v42 }
 0x179   : > { %1451 = vpow.bf16 %v683_v51  ;;  %v666_v4 = vpack.c.bf16 %v648_v36, %v646_v57  ;;  %v634_v33 = vsub.f32 %v2198_v14, %v594_v3  ;;  %v635_v27 = vsub.f32 %v2202_v18, %v594_v3  ;;  %v1446_v60 = vpop.eup %1445 }
 0x17a   : > { %1453 = vpow.bf16 %v686_v41  ;;  %v667_v2 = vpack.c.bf16 %v649_v62, %v647_v31  ;;  %v597_v59 = vpop.xlane.xlu0 %596  ;;  %v724_v8 = vunpack.c.h.bf16 %v1444_v12  ;;  %950 = vmatprep.mubr.bf16.mxu0 %v1446_v60  ;;  %v725_v15 = vunpack.c.h.bf16 %v1446_v60 }
 0x17b   : > { %v707_v58 = vmul.bf16 1069105081, %v666_v4  ;;  %v636_v34 = vsub.f32 %v2212_v22, %v597_v59  ;;  %v637_v61 = vsub.f32 %v2216_v21, %v597_v59  ;;  %v722_v63 = vunpack.c.l.bf16 %v1444_v12  ;;  %951 = vmatmul.mubr.bf16.gmra.mrb[4].mxu0 %v1444_v12 }
 0x17c   : > { %v710_v52 = vmul.bf16 1069105081, %v667_v2  ;;  %v618_v24 = vpop.xlane.xlu1 %617  ;;  %v723_v26 = vunpack.c.l.bf16 %v1446_v60  ;;  %v759_v6 = vadd.f32 %v725_v15, %v724_v8  ;;  %v777_v36 = vadd.f32 %v737_v16, %v736_v1 }
 0x17d   : > { %1455 = vpow.bf16 %v707_v58  ;;  %v650_v14 = vsub.f32 %v2222_v35, %v618_v24  ;;  %v660_v18 = vpack.c.bf16 %v636_v34, %v634_v33  ;;  %v661_v0 = vpack.c.bf16 %v637_v61, %v635_v27 }
 0x17e   : > { %1457 = vpow.bf16 %v710_v52  ;;  %v621_v25 = vpop.xlane.xlu0 %620  ;;  %v756_v48 = vadd.f32 %v723_v26, %v722_v63  ;;  %v651_v22 = vsub.f32 %v2224_v53, %v618_v24  ;;  %760 = vadd.xlane.f32.xlu0 %v759_v6  ;;  %v774_v62 = vadd.f32 %v735_v28, %v734_v19 }
 0x17f   : > { %v689_v21 = vmul.bf16 1069105081, %v660_v18  ;;  %v652_v43 = vsub.f32 %v2236_v23, %v621_v25  ;;  %v653_v32 = vsub.f32 %v2238_v29, %v621_v25  ;;  %v692_v30 = vmul.bf16 1069105081, %v661_v0 }
 0x180   : > { %v2298_v10 = vpop.eup %1447  ;;  %757 = vadd.xlane.f32.xlu1 %v756_v48 }
 0x181   : > { %v1450_v35 = vpop.eup %1449  ;;  %1459 = vpow.bf16 %v689_v21  ;;  %v668_v37 = vpack.c.bf16 %v652_v43, %v650_v14  ;;  %v669_v38 = vpack.c.bf16 %v653_v32, %v651_v22  ;;  %v740_v31 = vunpack.c.h.bf16 %v2298_v10 }
 0x182   : > { %1461 = vpow.bf16 %v692_v30  ;;  %982 = vmatprep.mubr.bf16.mxu1 %v1450_v35  ;;  %v741_v41 = vunpack.c.h.bf16 %v1450_v35  ;;  %v738_v3 = vunpack.c.l.bf16 %v2298_v10  ;;  %v739_v4 = vunpack.c.l.bf16 %v1450_v35 }
 0x183   : > { %v713_v11 = vmul.bf16 1069105081, %v668_v37  ;;  %v716_v54 = vmul.bf16 1069105081, %v669_v38  ;;  %983 = vmatmul.mubr.bf16.gmra.mrb[4].mxu1 %v2298_v10 }
 0x184   : > { %v1452_v53 = vpop.eup %1451  ;;  %v783_v27 = vadd.f32 %v741_v41, %v740_v31  ;;  %v780_v2 = vadd.f32 %v739_v4, %v738_v3 }
 0x185   : > { %v1454_v56 = vpop.eup %1453  ;;  %1463 = vpow.bf16 %v713_v11  ;;  %v728_v23 = vunpack.c.h.bf16 %v1452_v53  ;;  %v726_v29 = vunpack.c.l.bf16 %v1452_v53 }
 0x186   : > { %1465 = vpow.bf16 %v716_v54  ;;  %958 = vmatprep.mubr.bf16.mxu0 %v1454_v56  ;;  %v729_v39 = vunpack.c.h.bf16 %v1454_v56  ;;  %v727_v20 = vunpack.c.l.bf16 %v1454_v56 }
 0x187   : > { %959 = vmatmul.mubr.bf16.gmra.mrb[8].mxu0 %v1452_v53 }
 0x188   : > { %v1456_v40 = vpop.eup %1455  ;;  %v765_v45 = vadd.f32 %v729_v39, %v728_v23  ;;  %v762_v49 = vadd.f32 %v727_v20, %v726_v29 }
 0x189   : > { %v1458_v46 = vpop.eup %1457  ;;  %v744_v55 = vunpack.c.h.bf16 %v1456_v40  ;;  %v742_v12 = vunpack.c.l.bf16 %v1456_v40 }
 0x18a   : > { %766 = vadd.xlane.f32.xlu0 %v765_v45  ;;  %763 = vadd.xlane.f32.xlu1 %v762_v49  ;;  %v745_v42 = vunpack.c.h.bf16 %v1458_v46  ;;  %v743_v33 = vunpack.c.l.bf16 %v1458_v46 }
 0x18b   : > { %990 = vmatprep.mubr.bf16.mxu1 %v1458_v46 }
 0x18c   : > { %v1460_v47 = vpop.eup %1459  ;;  %991 = vmatmul.mubr.bf16.gmra.mrb[8].mxu1 %v1456_v40  ;;  %v789_v59 = vadd.f32 %v745_v42, %v744_v55  ;;  %v786_v60 = vadd.f32 %v743_v33, %v742_v12 }
 0x18d   : > { %v1462_v50 = vpop.eup %1461  ;;  %v732_v5 = vunpack.c.h.bf16 %v1460_v47  ;;  %v730_v9 = vunpack.c.l.bf16 %v1460_v47 }
 0x18e   : > { %966 = vmatprep.mubr.bf16.mxu0 %v1462_v50  ;;  %v733_v13 = vunpack.c.h.bf16 %v1462_v50  ;;  %v731_v44 = vunpack.c.l.bf16 %v1462_v50 }
 0x18f   : > { %967 = vmatmul.mubr.bf16.gmra.mrb[12].mxu0 %v1460_v47 }
 0x190   : > { %v1464_v7 = vpop.eup %1463  ;;  %v771_v17 = vadd.f32 %v733_v13, %v732_v5  ;;  %v768_v57 = vadd.f32 %v731_v44, %v730_v9 }
 0x191   : > { %v1466_v51 = vpop.eup %1465  ;;  %v748_v58 = vunpack.c.h.bf16 %v1464_v7  ;;  %v746_v61 = vunpack.c.l.bf16 %v1464_v7 }
 0x192   : > { %772 = vadd.xlane.f32.xlu0 %v771_v17  ;;  %769 = vadd.xlane.f32.xlu1 %v768_v57  ;;  %v749_v34 = vunpack.c.h.bf16 %v1466_v51  ;;  %v747_v8 = vunpack.c.l.bf16 %v1466_v51 }
 0x193   : > { %998 = vmatprep.mubr.bf16.mxu1 %v1466_v51 }
 0x194   : > { %999 = vmatmul.mubr.bf16.gmra.mrb[12].mxu1 %v1464_v7  ;;  %v795_v52 = vadd.f32 %v749_v34, %v748_v58  ;;  %v792_v24 = vadd.f32 %v747_v8, %v746_v61 }
 0x196   : > { %778 = vadd.xlane.f32.xlu0 %v777_v36  ;;  %775 = vadd.xlane.f32.xlu1 %v774_v62 }
 0x19a   : > { %784 = vadd.xlane.f32.xlu0 %v783_v27  ;;  %781 = vadd.xlane.f32.xlu1 %v780_v2 }
 0x19e   : > { %790 = vadd.xlane.f32.xlu0 %v789_v59  ;;  %787 = vadd.xlane.f32.xlu1 %v786_v60 }
 0x1a2   : > { %796 = vadd.xlane.f32.xlu0 %v795_v52  ;;  %793 = vadd.xlane.f32.xlu1 %v792_v24 }
 0x200   : > { %v752_v15 = vpop.xlane.xlu1 %751  ;;  %v755_v63 = vpop.xlane.xlu0 %754 }
 0x201   : > { %1467 = vrcp.f32 %v752_v15 }
 0x202   : > { %1469 = vrcp.f32 %v755_v63 }
 0x20b   : > { %v761_v14 = vpop.xlane.xlu0 %760  ;;  %v1468_v30 = vpop.eup %1467 }
 0x20c   : > { %v1470_v11 = vpop.eup %1469 }
 0x20d   : > { %v758_v26 = vpop.xlane.xlu1 %757 }
 0x217   : > { %v764_v18 = vpop.xlane.xlu1 %763  ;;  %v767_v0 = vpop.xlane.xlu0 %766 }
 0x21f   : > { %v770_v25 = vpop.xlane.xlu1 %769  ;;  %v2307_v6 = vpop.xlane.xlu0 %772 }
 0x223   : > { %v776_v48 = vpop.xlane.xlu1 %775  ;;  %v779_v22 = vpop.xlane.xlu0 %778 }
 0x224   : > { %1471 = vrcp.f32 %v776_v48 }
 0x225   : > { %1473 = vrcp.f32 %v779_v22 }
 0x226   : > { %1475 = vrcp.f32 %v758_v26 }
 0x227   : > { %1477 = vrcp.f32 %v761_v14  ;;  %v782_v54 = vpop.xlane.xlu1 %781  ;;  %v785_v39 = vpop.xlane.xlu0 %784 }
 0x228   : > { %1479 = vrcp.f32 %v782_v54 }
 0x22b   : > { %v788_v31 = vpop.xlane.xlu1 %787  ;;  %v791_v27 = vpop.xlane.xlu0 %790 }
 0x22e   : > { %v1472_v46 = vpop.eup %1471 }
 0x22f   : > { %v1474_v1 = vpop.eup %1473 }
 0x230   : > { %v1476_v28 = vpop.eup %1475 }
 0x231   : > { %v1478_v62 = vpop.eup %1477 }
 0x232   : > { %v1480_v34 = vpop.eup %1479 }
 0x243   : > { %v1302_v21 = vpop.f32.mrb[0].mxu0 }
 0x244   : > { %v1303_v43 = vpop.f32.mrb[1].mxu0 }
 0x245   : > { %v1304_v32 = vadd.f32 %v1303_v43, %v1302_v21  ;;  %v1305_v10 = vpop.f32.mrb[2].mxu0 }
 0x246   : > { %v1306_v35 = vpop.f32.mrb[3].mxu0 }
 0x247   : > { %v2309_v37 = vmul.f32 %v1468_v30, %v1304_v32  ;;  %v1307_v38 = vadd.f32 %v1306_v35, %v1305_v10  ;;  %v797_v30 = vpop.xlane.xlu0 %796 }
 0x249   : > { %v1039_v53 = vmin.f32 %v2309_v37, 0.0  ;;  %v2312_v56 = vmul.f32 %v1470_v11, %v1307_v38  ;;  %v1326_v23 = vpop.f32.mrb[0].mxu1  ;;  %vm1023_vm0 = vcmp.gt.f32.partialorder %v2309_v37, 0.0 }
 0x24a   : > { %v1327_v29 = vpop.f32.mrb[1].mxu1 }
 0x24b   : > { %v1055_v20 = vmul.f32 1.442695, %v1039_v53  ;;  %v1040_v40 = vmin.f32 %v2312_v56, 0.0  ;;  %v1328_v45 = vadd.f32 %v1327_v29, %v1326_v23  ;;  %v1329_v49 = vpop.f32.mrb[2].mxu1  ;;  %vm1024_vm1 = vcmp.gt.f32.partialorder %v2312_v56, 0.0 }
 0x24c   : > { %v1330_v47 = vpop.f32.mrb[3].mxu1 }
 0x24d   : > { %1481 = vpow2.f32 %v1055_v20  ;;  %v1057_v5 = vmul.f32 1.442695, %v1040_v40  ;;  %v2315_v9 = vmul.f32 %v1472_v46, %v1328_v45  ;;  %v1331_v13 = vadd.f32 %v1330_v47, %v1329_v49 }
 0x24e   : > { %v1308_v50 = vpop.f32.mrb[4].mxu0  ;;  %1483 = vrcp.f32 %v785_v39 }
 0x24f   : > { %v1309_v44 = vpop.f32.mrb[5].mxu0  ;;  %1485 = vpow2.f32 %v1057_v5  ;;  %v1047_v7 = vmin.f32 %v2315_v9, 0.0  ;;  %v2318_v17 = vmul.f32 %v1474_v1, %v1331_v13  ;;  %vm1031_vm2 = vcmp.gt.f32.partialorder %v2315_v9, 0.0 }
 0x250   : > { %v1310_v16 = vadd.f32 %v1309_v44, %v1308_v50  ;;  %v1311_v19 = vpop.f32.mrb[6].mxu0  ;;  %1487 = vrcp.f32 %v764_v18  ;;  %v794_v18 = vpop.xlane.xlu1 %793 }
 0x251   : > { %v1312_v57 = vpop.f32.mrb[7].mxu0  ;;  %1489 = vrcp.f32 %v767_v0  ;;  %v1071_v41 = vmul.f32 1.442695, %v1047_v7  ;;  %v1048_v3 = vmin.f32 %v2318_v17, 0.0  ;;  %vm1032_vm3 = vcmp.gt.f32.partialorder %v2318_v17, 0.0 }
 0x252   : > { %v2320_v51 = vmul.f32 %v1476_v28, %v1310_v16  ;;  %v1313_v36 = vadd.f32 %v1312_v57, %v1311_v19  ;;  %1491 = vrcp.f32 %v770_v25 }
 0x253   : > { %1493 = vpow2.f32 %v1071_v41  ;;  %v1073_v12 = vmul.f32 1.442695, %v1048_v3 }
 0x254   : > { %v1041_v4 = vmin.f32 %v2320_v51, 0.0  ;;  %v2324_v55 = vmul.f32 %v1478_v62, %v1313_v36  ;;  %1495 = vrcp.f32 %v788_v31  ;;  %vm1025_vm4 = vcmp.gt.f32.partialorder %v2320_v51, 0.0 }
 0x255   : > { %1497 = vpow2.f32 %v1073_v12 }
 0x256   : > { %v1332_v42 = vpop.f32.mrb[4].mxu1  ;;  %v1059_v2 = vmul.f32 1.442695, %v1041_v4  ;;  %v1042_v59 = vmin.f32 %v2324_v55, 0.0  ;;  %vm1026_vm5 = vcmp.gt.f32.partialorder %v2324_v55, 0.0 }
 0x257   : > { %v1333_v33 = vpop.f32.mrb[5].mxu1  ;;  %v1482_v63 = vpop.eup %1481 }
 0x258   : > { %v1334_v60 = vadd.f32 %v1333_v33, %v1332_v42  ;;  %v1335_v58 = vpop.f32.mrb[6].mxu1  ;;  %1499 = vpow2.f32 %v1059_v2  ;;  %v1061_v8 = vmul.f32 1.442695, %v1042_v59  ;;  %v1484_v14 = vpop.eup %1483  ;;  %v1262_v0 = vadd.f32 -1.0, %v1482_v63 }
 0x259   : > { %v1336_v61 = vpop.f32.mrb[7].mxu1  ;;  %1501 = vrcp.f32 %v791_v27  ;;  %v1486_v22 = vpop.eup %1485 }
 0x25a   : > { %v2328_v52 = vmul.f32 %v1480_v34, %v1334_v60  ;;  %v1337_v24 = vadd.f32 %v1336_v61, %v1335_v58  ;;  %v1314_v15 = vpop.f32.mrb[8].mxu0  ;;  %1503 = vpow2.f32 %v1061_v8  ;;  %v1488_v10 = vpop.eup %1487  ;;  %v1103_v35 = vsel %vm1023_vm0, %v2309_v37, %v1262_v0 }
 0x25b   : > { %v1315_v26 = vpop.f32.mrb[9].mxu0  ;;  %1505 = vrcp.f32 %v2307_v6  ;;  %v1263_v38 = vadd.f32 -1.0, %v1486_v22  ;;  %v1490_v53 = vpop.eup %1489  ;;  %1119 = vst [vmem:[%s2338_s30] sm:$0xff] %v1103_v35 }
 0x25c   : > { %v1049_v25 = vmin.f32 %v2328_v52, 0.0  ;;  %v1317_v48 = vpop.f32.mrb[10].mxu0  ;;  %v2333_v21 = vmul.f32 %v1484_v14, %v1337_v24  ;;  %v1316_v43 = vadd.f32 %v1315_v26, %v1314_v15  ;;  %1507 = vrcp.f32 %v794_v18  ;;  %v1492_v39 = vpop.eup %1491 }
 0x25d   : > { %v1318_v32 = vpop.f32.mrb[11].mxu0  ;;  %v1104_v37 = vsel %vm1024_vm1, %v2312_v56, %v1263_v38  ;;  %v1494_v45 = vpop.eup %1493  ;;  %vm1033_vm6 = vcmp.gt.f32.partialorder %v2328_v52, 0.0 }
 0x25e   : > { %v1075_v11 = vmul.f32 1.442695, %v1049_v25  ;;  %v1319_v54 = vadd.f32 %v1318_v32, %v1317_v48  ;;  %v1050_v6 = vmin.f32 %v2333_v21, 0.0  ;;  %v2343_v23 = vmul.f32 %v1488_v10, %v1316_v43  ;;  %1120 = vst [vmem:[%s2338_s30 + $0x8] sm:$0xff] %v1104_v37  ;;  %v1496_v5 = vpop.eup %1495 }
 0x25f   : > { %v1338_v29 = vpop.f32.mrb[8].mxu1  ;;  %v1270_v13 = vadd.f32 -1.0, %v1494_v45  ;;  %v1498_v16 = vpop.eup %1497  ;;  %vm1034_vm7 = vcmp.gt.f32.partialorder %v2333_v21, 0.0 }
 0x260   : > { %1509 = vpow2.f32 %v1075_v11  ;;  %v2346_v20 = vmul.f32 %v1490_v53, %v1319_v54  ;;  %v1339_v40 = vpop.f32.mrb[9].mxu1  ;;  %v1077_v49 = vmul.f32 1.442695, %v1050_v6  ;;  %v1043_v46 = vmin.f32 %v2343_v23, 0.0 }
 0x261   : > { %1511 = vrcp.f32 %v797_v30  ;;  %v1340_v47 = vadd.f32 %v1339_v40, %v1338_v29  ;;  %v1341_v50 = vpop.f32.mrb[10].mxu1  ;;  %v1111_v62 = vsel %vm1031_vm2, %v2315_v9, %v1270_v13  ;;  %v1271_v31 = vadd.f32 -1.0, %v1498_v16 }
 0x262   : > { %v1044_v56 = vmin.f32 %v2346_v20, 0.0  ;;  %v1342_v44 = vpop.f32.mrb[11].mxu1  ;;  %v1320_v1 = vpop.f32.mrb[12].mxu0  ;;  %1513 = vpow2.f32 %v1077_v49  ;;  %v1063_v19 = vmul.f32 1.442695, %v1043_v46  ;;  %1127 = vst [vmem:[%s2338_s30 + $0x40] sm:$0xff] %v1111_v62 }
 0x263   : > { %v2353_v28 = vmul.f32 %v1496_v5, %v1340_v47  ;;  %v1343_v7 = vadd.f32 %v1342_v44, %v1341_v50  ;;  %v1321_v57 = vpop.f32.mrb[13].mxu0  ;;  %v1500_v36 = vpop.eup %1499  ;;  %v1112_v9 = vsel %vm1032_vm3, %v2318_v17, %v1271_v31  ;;  %vm1027_vm8 = vcmp.gt.f32.partialorder %v2343_v23, 0.0 }
 0x264   : > { %v1065_v41 = vmul.f32 1.442695, %v1044_v56  ;;  %v1322_v3 = vadd.f32 %v1321_v57, %v1320_v1  ;;  %v1323_v4 = vpop.f32.mrb[14].mxu0  ;;  %v1502_v42 = vpop.eup %1501  ;;  %v1264_v12 = vadd.f32 -1.0, %v1500_v36  ;;  %1515 = vpow2.f32 %v1063_v19  ;;  %1128 = vst [vmem:[%s2338_s30 + $0x48] sm:$0xff] %v1112_v9 }
 0x265   : > { %v1051_v33 = vmin.f32 %v2353_v28, 0.0  ;;  %v1324_v27 = vpop.f32.mrb[15].mxu0  ;;  %v1504_v2 = vpop.eup %1503  ;;  %v2362_v59 = vmul.f32 %v1502_v42, %v1343_v7  ;;  %vm1028_vm9 = vcmp.gt.f32.partialorder %v2346_v20, 0.0  ;;  %vm1035_vm10 = vcmp.gt.f32.partialorder %v2353_v28, 0.0 }
 0x266   : > { %1517 = vpow2.f32 %v1065_v41  ;;  %v2364_v60 = vmul.f32 %v1492_v39, %v1322_v3  ;;  %v1506_v58 = vpop.eup %1505  ;;  %v1105_v34 = vsel %vm1025_vm4, %v2320_v51, %v1264_v12  ;;  %v1265_v61 = vadd.f32 -1.0, %v1504_v2 }
 0x267   : > { %v1079_v8 = vmul.f32 1.442695, %v1051_v33  ;;  %v1325_v24 = vadd.f32 %v1324_v27, %v1323_v4  ;;  %v1344_v15 = vpop.f32.mrb[12].mxu1  ;;  %1121 = vst [vmem:[%s2338_s30 + $0x10] sm:$0xff] %v1105_v34  ;;  %v1052_v63 = vmin.f32 %v2362_v59, 0.0  ;;  %v1508_v14 = vpop.eup %1507  ;;  %vm1036_vm11 = vcmp.gt.f32.partialorder %v2362_v59, 0.0 }
 0x268   : > { %v1045_v17 = vmin.f32 %v2364_v60, 0.0  ;;  %v1345_v26 = vpop.f32.mrb[13].mxu1  ;;  %v1106_v18 = vsel %vm1026_vm5, %v2324_v55, %v1265_v61  ;;  %vm1029_vm12 = vcmp.gt.f32.partialorder %v2364_v60, 0.0 }
 0x269   : > { %1519 = vpow2.f32 %v1079_v8  ;;  %v1014_v0 = vmul.f32 %v1506_v58, %v1325_v24  ;;  %v1346_v25 = vadd.f32 %v1345_v26, %v1344_v15  ;;  %v1347_v51 = vpop.f32.mrb[14].mxu1  ;;  %1122 = vst [vmem:[%s2338_s30 + $0x18] sm:$0xff] %v1106_v18  ;;  %v1081_v22 = vmul.f32 1.442695, %v1052_v63 }
 0x26a   : > { %v1510_v48 = vpop.eup %1509  ;;  %v1067_v43 = vmul.f32 1.442695, %v1045_v17  ;;  %v1348_v32 = vpop.f32.mrb[15].mxu1 }
 0x26b   : > { %v1512_v10 = vpop.eup %1511  ;;  %v1272_v30 = vadd.f32 -1.0, %v1510_v48  ;;  %v1046_v35 = vmin.f32 %v1014_v0, 0.0  ;;  %v1021_v38 = vmul.f32 %v1508_v14, %v1346_v25  ;;  %1521 = vpow2.f32 %v1081_v22 }
 0x26c   : > { %v1349_v11 = vadd.f32 %v1348_v32, %v1347_v51  ;;  %v1514_v55 = vpop.eup %1513  ;;  %1523 = vpow2.f32 %v1067_v43  ;;  %vm1030_vm13 = vcmp.gt.f32.partialorder %v1014_v0, 0.0 }
 0x26d   : > { %v1113_v54 = vsel %vm1033_vm6, %v2328_v52, %v1272_v30  ;;  %v1069_v53 = vmul.f32 1.442695, %v1046_v35  ;;  %v1273_v6 = vadd.f32 -1.0, %v1514_v55  ;;  %v1053_v29 = vmin.f32 %v1021_v38, 0.0 }
 0x26e   : > { %1129 = vst [vmem:[%s2338_s30 + $0x50] sm:$0xff] %v1113_v54  ;;  %v1022_v39 = vmul.f32 %v1512_v10, %v1349_v11  ;;  %v1516_v37 = vpop.eup %1515  ;;  %vm1037_vm14 = vcmp.gt.f32.partialorder %v1021_v38, 0.0 }
 0x26f   : > { %1525 = vpow2.f32 %v1069_v53  ;;  %v1114_v45 = vsel %vm1034_vm7, %v2333_v21, %v1273_v6  ;;  %v1266_v49 = vadd.f32 -1.0, %v1516_v37  ;;  %v1083_v46 = vmul.f32 1.442695, %v1053_v29 }
 0x270   : > { %v1518_v40 = vpop.eup %1517  ;;  %1130 = vst [vmem:[%s2338_s30 + $0x58] sm:$0xff] %v1114_v45  ;;  %v1054_v47 = vmin.f32 %v1022_v39, 0.0  ;;  %vm1038_vm15 = vcmp.gt.f32.partialorder %v1022_v39, 0.0 }
 0x271   : > { %v1267_v52 = vadd.f32 -1.0, %v1518_v40  ;;  %v1107_v50 = vsel %vm1027_vm8, %v2343_v23, %v1266_v49  ;;  %1527 = vpow2.f32 %v1083_v46 }
 0x272   : > { %1123 = vst [vmem:[%s2338_s30 + $0x20] sm:$0xff] %v1107_v50  ;;  %v1085_v56 = vmul.f32 1.442695, %v1054_v47 }
 0x273   : > { %v1520_v5 = vpop.eup %1519  ;;  %v1108_v13 = vsel %vm1028_vm9, %v2346_v20, %v1267_v52 }
 0x274   : > { %1124 = vst [vmem:[%s2338_s30 + $0x28] sm:$0xff] %v1108_v13  ;;  %v1274_v21 = vadd.f32 -1.0, %v1520_v5  ;;  %1529 = vpow2.f32 %v1085_v56 }
 0x275   : > { %v1522_v44 = vpop.eup %1521 }
 0x276   : > { %v1115_v1 = vsel %vm1035_vm10, %v2353_v28, %v1274_v21  ;;  %v1524_v23 = vpop.eup %1523  ;;  %v1275_v16 = vadd.f32 -1.0, %v1522_v44 }
 0x277   : > { %1131 = vst [vmem:[%s2338_s30 + $0x60] sm:$0xff] %v1115_v1  ;;  %v1268_v20 = vadd.f32 -1.0, %v1524_v23 }
 0x278   : > { %v1116_v7 = vsel %vm1036_vm11, %v2362_v59, %v1275_v16 }
 0x279   : > { %v1526_v19 = vpop.eup %1525  ;;  %1132 = vst [vmem:[%s2338_s30 + $0x68] sm:$0xff] %v1116_v7  ;;  %v1109_v57 = vsel %vm1029_vm12, %v2364_v60, %v1268_v20 }
 0x27a   : > { %v1269_v36 = vadd.f32 -1.0, %v1526_v19  ;;  %1125 = vst [vmem:[%s2338_s30 + $0x30] sm:$0xff] %v1109_v57 }
 0x27b   : > { %v1528_v28 = vpop.eup %1527 }
 0x27c   : > { %v1110_v62 = vsel %vm1030_vm13, %v1014_v0, %v1269_v36  ;;  %v1276_v31 = vadd.f32 -1.0, %v1528_v28 }
 0x27d   : > { %1126 = vst [vmem:[%s2338_s30 + $0x38] sm:$0xff] %v1110_v62 }
 0x27e   : > { %v1530_v41 = vpop.eup %1529  ;;  %v1117_v3 = vsel %vm1037_vm14, %v1021_v38, %v1276_v31 }
 0x27f   : > { %1133 = vst [vmem:[%s2338_s30 + $0x70] sm:$0xff] %v1117_v3  ;;  %v1277_v4 = vadd.f32 -1.0, %v1530_v41 }
 0x281   : > { %v1118_v42 = vsel %vm1038_vm15, %v1022_v39, %v1277_v4 }
 0x282   : > { %1134 = vst [vmem:[%s2338_s30 + $0x78] sm:$0xff] %v1118_v42 }
 0x283   : > { %1574 = shalt.err (!%p1571_p4)
}
 0x284   : > { %s1575_s12 = scalar_lea.hbm %s2402_s14, 2048  ;;  %s1579_s25 = scalar_lea.hbm %s2453_s4, 4096 }
 0x285   : > { %p1576_p5 = scmp.ne.s32.totalorder %s2402_s14, %s1575_s12  ;;  %p1580_p1 = scmp.lt.u32.totalorder %s2402_s14, %s2453_s4 }
 0x286   : > { %p1581_p3 = scmp.lt.u32.totalorder %s1579_s25, %s1575_s12  ;;  %p1583_p6 = scmp.lt.u32.totalorder %s1575_s12, %s2402_s14 }
 0x287   : > { %p1577_p7 = pnand %p1576_p5, %p2460_p12 }
 0x288   : > { %p1582_p11 = por %p1581_p3, %p1580_p1 }
 0x289   : > { %p1578_p9 = pneg %p1577_p7 }
 0x28a   : > { %p1584_p13 = por %p1583_p6, %p1582_p11 }
 0x28c   : > { %p1585_p8 = pnand %p1584_p13, %p1578_p9 }
 0x28e   : > { %1588 = shalt.err (!%p1585_p8)
}
 0x28f   : > { %s1634_s30 = smov 128   ;;  %s1635_s5 = smov 8  }
 0x290   : > { %1368 = dma.vmem_to_hbm [thread:$0]  (%p2460_p12), %s2404_s6, 2048, %s2402_s14, %s1136_s19, %s1634_s30, %s1634_s30, %s1635_s5  }
 0x291 PF: > { %s1164_s7 = sand.u32 1, %s1615_s15   ;;  %p2461_p10 = scmp.ne.s32.totalorder %s2458_s28, 0 }
 0x292   : > { %p2462_p0 = scmp.ge.s32.totalorder %s1627_s18, 2  ;;  %s1165_s9 = scalar_lea.sflag [#allocation4], %s1164_s7 }
 0x294   : > { %p1375_p2 = pnand %p2462_p0, %p2461_p10 }
 0x296   : > { %1610 = dma.done.wait (!%p1375_p2), %s1165_s9, 2048  }
 0x297   : > { %1612 = vsyncadd (!%p1375_p2), %s1165_s9, 4294965248  ;;  %p17_p4 = scmp.ge.s32.totalorder %s1686_s21, 4   ;;  %s2463_s15 = smov %s1619_s16 }
 0x298   : > { %s2464_s16 = smov %s1623_s17  ;;  %s2465_s17 = smov %s1698_s24 }
 0x299   : > { %s2466_s18 = smov %s1686_s21  ;;  %19 = sbr.rel (!%p17_p4) target bundleno = 5 (0x5), region = 84 }
 0x2a0   :  { %1170 = vsyncpa [#allocation3], 1 }
 0x2a1   :  { %1172 = vsyncpa [#allocation3 + $0x1], 1 }
 0x2a2   :  { %1173 = vsyncpa [#allocation4], 1 }
 0x2a3   :  { %1175 = vsyncpa [#allocation4 + $0x1], 1 }

</bundles_post_ra>
